<compile_context>
chip_gen: v7x
topology: tpu7x:2x2x1
jax: 0.10.0
libtpu: 0.0.40
codegen_flags: <defaults>
</compile_context>

<pallas_src>
import math
import functools

import jax
import jax.numpy as jnp
from jax import lax
from jax.experimental import pallas as pl
from jax.experimental.pallas import tpu as pltpu


# ----------------------------- kernels ------------------------------------ #

def _pe_add_kernel(x_ref, pe_ref, o_ref):
    # x_ref/o_ref: (ts, B, D); pe_ref: (ts, 1, D) -> sublane-broadcast over B.
    # pe is pre-cast to x's dtype in the wrapper: one same-dtype VPU add.
    o_ref[...] = x_ref[...] + pe_ref[...]


def _pe_add_dropout_kernel(seed_ref, x_ref, pe_ref, o_ref, *, p):
    """(x + pe) then inverted dropout: keep w.p. (1-p), scale kept by 1/(1-p).

    RNG is a stateless hash of (seed, global element index), so the mask is
    identical for any tile size / grid layout and needs no TPU PRNG state.
    Two-stage hash keeps the per-element VALU cost low (~9 int ops/element):
      stage 1: full murmur3-style avalanche of a per-(seq row, batch) key,
               computed on a (ts, B, 1) array (d_model x fewer elements);
      stage 2: 2-round uint32 mix of that key with the lane (d_model) index,
               consumed by a single unsigned threshold compare.
    # TODO(synk): the mask does not bit-match torch's RNG stream; the Dropout
    # semantics (Bernoulli(1-p) keep, 1/(1-p) rescale) are otherwise exact.
    """
    ts, B, D = x_ref.shape

    # Broadcast add in x's dtype (no blanket f32 upcast of the tile).
    y = x_ref[...] + pe_ref[...]

    # ---- stage 1: per-(row, batch) key, shape (ts, B, 1) -------------------
    s0 = pl.program_id(0) * ts
    r = lax.broadcasted_iota(jnp.int32, (ts, B, 1), 0) + s0
    b = lax.broadcasted_iota(jnp.int32, (ts, B, 1), 1)
    rowkey = (r * B + b + seed_ref[0]).astype(jnp.uint32)  # global (seq,batch) id
    h = rowkey * jnp.uint32(0x9E3779B9)                    # golden-ratio spread
    h = h ^ (h >> 16)                                      # murmur3 finalizer
    h = h * jnp.uint32(0x85EBCA6B)
    h = h ^ (h >> 13)
    h = h * jnp.uint32(0xC2B2AE35)
    h = h ^ (h >> 16)

    # ---- stage 2: fold in the lane index (cheap per-element mix) -----------
    d = lax.broadcasted_iota(jnp.int32, (ts, B, D), 2).astype(jnp.uint32)
    e = h + d * jnp.uint32(0x01000193)                     # broadcast key over lanes
    e = e ^ (e >> 15)
    e = e * jnp.uint32(0x2C1B3C6D)
    e = e ^ (e >> 12)

    # keep iff e >= p * 2^32  (single unsigned compare; P(keep) = 1 - p).
    thresh = jnp.uint32(min(int(round(p * 4294967296.0)), 0xFFFFFFFF))
    keep = e >= thresh
    scale = 1.0 / (1.0 - p)                                # trace-time const
    o_ref[...] = jnp.where(keep, y * scale, jnp.zeros_like(y)).astype(o_ref.dtype)


# --------------------------- parameter setup ------------------------------ #

def make_pe_table(max_len, d_model, dtype=jnp.float32):
    """Sinusoidal table identical to the torch __init__ (even d_model)."""
    position = jnp.arange(max_len, dtype=jnp.float32)[:, None]                 # (L, 1)
    div_term = jnp.exp(jnp.arange(0, d_model, 2, dtype=jnp.float32)
                       * (-math.log(10000.0) / d_model))                       # (D/2,)
    ang = position * div_term                                                  # (L, D/2)
    pe = jnp.zeros((max_len, d_model), dtype=jnp.float32)
    pe = pe.at[:, 0::2].set(jnp.sin(ang))
    pe = pe.at[:, 1::2].set(jnp.cos(ang))
    return pe.astype(dtype)


# --------------------------- tiling helpers -------------------------------- #

def _vmem_capacity_bytes():
    try:
        return int(pltpu.get_tpu_info().vmem_capacity_bytes)
    except Exception:
        return 64 * 1024 * 1024     # conservative: v7x physical VMEM per core


def _round_up(x, m):
    return ((x + m - 1) // m) * m


def _pick_tile_s(S, B, D, itemsize, min_grid_steps=8):
    """Seq-tile size: blocks big enough for HBM roofline, but enough grid
    steps for pipelining + 2-TensorCore sharding, using the *padded*
    (sublane x 128-lane) VMEM footprint of the trailing (B, D) block dims."""
    sub = 8 if itemsize >= 4 else 32 // itemsize        # 8 f32 / 16 bf16 sublanes
    lane_d = _round_up(D, 128)
    row_x = _round_up(B, sub) * lane_d * itemsize       # padded bytes per seq row
    row_pe = sub * lane_d * itemsize                    # (ts, 1, D) pads B dim to sub
    # Double-buffered working set per seq row: x-in (x2) + out (x2) + pe (x2).
    per_row = 2 * (2 * row_x + row_pe)
    budget = _vmem_capacity_bytes() // 4                # headroom under scoped limit
    tile = max(1, budget // max(per_row, 1))
    # Keep >= ~min_grid_steps grid steps so v7x can shard across its 2 cores
    # and the BlockSpec pipeline actually overlaps DMA with compute.
    tile = min(tile, max(1, (S + min_grid_steps - 1) // min_grid_steps), S)
    return max(1, int(tile))


# ------------------------------ wrapper ------------------------------------ #

def positional_encoding(x, pe_table, *, p=0.1, training=False, seed=0,
                        tile_s=None, donate_x=False):
    """x: (S, B, D) seq-first; pe_table: (max_len, D). Returns (S, B, D).

    donate_x: set True only when the caller actually donates x (e.g. via
    jax.jit donate_argnums); aliasing a non-donated input makes XLA insert a
    defensive full copy of x (an extra HBM read+write pass).
    """
    S, B, D = x.shape
    # Glue in plain JAX: slice to S rows, pre-cast to x.dtype (so the kernel is
    # a single same-dtype add), and add the broadcast (batch) axis.
    pe_s = pe_table[:S, :].astype(x.dtype).reshape(S, 1, D)

    if tile_s is None:
        tile_s = _pick_tile_s(S, B, D, jnp.dtype(x.dtype).itemsize)
    grid = (pl.cdiv(S, tile_s),)                  # ragged tail handled by Pallas
    out_shape = jax.ShapeDtypeStruct(x.shape, x.dtype)

    vmem = _vmem_capacity_bytes()
    compiler_params = pltpu.CompilerParams(
        # Independent seq-tiles: lets Mosaic shard grid steps across both
        # TensorCores on v7x (harmless no-op on single-core v5e / v6e).
        dimension_semantics=("parallel",),
        # Explicit scoped-VMEM cap with headroom (v7x has only 64 MiB physical).
        vmem_limit_bytes=int(min(vmem // 2, 64 * 1024 * 1024)),
    )

    # Layout: d_model on lanes (dense when D % 128 == 0), batch on sublanes --
    # optimal for B >= 8 (f32) / 16 (bf16).
    # TODO(synk): for B below the sublane count, a flattened (S*B, D) layout
    # with an in-kernel pe sublane-repeat would avoid masked (vst.msk) stores;
    # kept 3-D here because the in-kernel relayout is the riskier trade.

    if (not training) or p == 0.0:
        # Eval: Dropout is the identity -> plain broadcast add.  NOTE: inside a
        # full model prefer writing `x + pe` in JAX and letting XLA fuse it
        # into neighbouring ops; a standalone streaming pass can at best reach
        # the HBM roofline (one full read + write of x).
        alias = {0: 0} if donate_x else {}
        return pl.pallas_call(
            _pe_add_kernel,
            grid=grid,
            in_specs=[pl.BlockSpec((tile_s, B, D), lambda i: (i, 0, 0)),
                      pl.BlockSpec((tile_s, 1, D), lambda i: (i, 0, 0))],
            out_specs=pl.BlockSpec((tile_s, B, D), lambda i: (i, 0, 0)),
            out_shape=out_shape,
            input_output_aliases=alias,
            compiler_params=compiler_params,
        )(x, pe_s)

    kernel = functools.partial(_pe_add_dropout_kernel, p=float(p))
    grid_spec = pltpu.PrefetchScalarGridSpec(
        num_scalar_prefetch=1,             # seed lands in SMEM
        grid=grid,
        in_specs=[pl.BlockSpec((tile_s, B, D), lambda i, s: (i, 0, 0)),
                  pl.BlockSpec((tile_s, 1, D), lambda i, s: (i, 0, 0))],
        out_specs=pl.BlockSpec((tile_s, B, D), lambda i, s: (i, 0, 0)),
    )
    seed_arr = jnp.array([seed], dtype=jnp.int32)
    # x is operand 1 here (operand 0 is the scalar-prefetched seed).
    alias = {1: 0} if donate_x else {}
    return pl.pallas_call(
        kernel,
        grid_spec=grid_spec,
        out_shape=out_shape,
        input_output_aliases=alias,
        compiler_params=compiler_params,
    )(seed_arr, x, pe_s)


# -------------------------------- main ------------------------------------- #

if __name__ == "__main__":
    S, B, D = 8, 2, 32        # seq_len, batch, d_model (small demo shapes)
    MAX_LEN = 64
    P_DROP = 0.1

    key = jax.random.PRNGKey(0)
    x = jax.random.normal(key, (S, B, D), dtype=jnp.float32)
    pe_table = make_pe_table(MAX_LEN, D)

    # Pure-JAX reference for eval mode.
    ref = x + pe_table[:S, :][:, None, :]

    # Eval mode (dropout == identity): exact semantics.
    out_eval = jax.block_until_ready(
        positional_encoding(x, pe_table, p=P_DROP, training=False))
    assert out_eval.shape == (S, B, D)
    assert jnp.allclose(out_eval, ref, atol=1e-6), "eval-mode mismatch"

    # Training mode: every output element must be either 0 (dropped) or
    # (x + pe) / (1 - p) (kept & rescaled).
    out_train = jax.block_until_ready(
        positional_encoding(x, pe_table, p=P_DROP, training=True, seed=123))
    assert out_train.shape == (S, B, D)
    scaled = ref / (1.0 - P_DROP)
    elem_ok = jnp.where(out_train == 0.0, True,
                        jnp.isclose(out_train, scaled, rtol=1e-5, atol=1e-5))
    assert bool(jnp.all(elem_ok)), "train-mode values are not {0, (x+pe)/(1-p)}"
    n_drop = int(jnp.sum(out_train == 0.0))
    assert 0 < n_drop < out_train.size, "degenerate dropout mask"

    print("KERNEL_OK")
</pallas_src>

<mosaic_0001>
module attributes {stable_mosaic.version = 11 : i64} {
  func.func @_pe_add_kernel(%arg0: i32, %arg1: memref<1x2x32xf32, #tpu.memory_space<vmem>>, %arg2: memref<1x1x32xf32, #tpu.memory_space<vmem>>, %arg3: memref<1x2x32xf32, #tpu.memory_space<vmem>>) attributes {dimension_semantics = [#tpu.dimension_semantics<parallel>], iteration_bounds = array<i64: 8>, scalar_prefetch = 0 : i64, scratch_operands = 0 : i64, tpu.core_type = #tpu.core_type<tc>, window_params = [{transform_indices = @transform_0, window_bounds = array<i64: 1, 2, 32>}, {transform_indices = @transform_1, window_bounds = array<i64: 1, 1, 32>}, {transform_indices = @transform_2, window_bounds = array<i64: 1, 2, 32>}]} {
    %c0 = arith.constant 0 : index
    %c0_0 = arith.constant 0 : index
    %c0_1 = arith.constant 0 : index
    %0 = vector.load %arg1[%c0, %c0_0, %c0_1] : memref<1x2x32xf32, #tpu.memory_space<vmem>>, vector<1x2x32xf32>
    %c0_2 = arith.constant 0 : index
    %c0_3 = arith.constant 0 : index
    %c0_4 = arith.constant 0 : index
    %1 = vector.load %arg2[%c0_2, %c0_3, %c0_4] : memref<1x1x32xf32, #tpu.memory_space<vmem>>, vector<1x1x32xf32>
    %2 = vector.broadcast %1 : vector<1x1x32xf32> to vector<1x2x32xf32>
    %3 = arith.addf %0, %2 : vector<1x2x32xf32>
    %c0_5 = arith.constant 0 : index
    %c0_6 = arith.constant 0 : index
    %c0_7 = arith.constant 0 : index
    %4 = vector.load %arg3[%c0_5, %c0_6, %c0_7] : memref<1x2x32xf32, #tpu.memory_space<vmem>>, vector<1x2x32xf32>
    tpu.vector_store %arg3[%c0_5, %c0_6, %c0_7], %3 {strides = array<i32>} : memref<1x2x32xf32, #tpu.memory_space<vmem>>, vector<1x2x32xf32>,
    return
  }
  func.func @transform_0(%arg0: i32) -> (i32, i32, i32) {
    %c0_i32 = arith.constant 0 : i32
    %c0_i32_0 = arith.constant 0 : i32
    %c0_i32_1 = arith.constant 0 : i32
    return %arg0, %c0_i32, %c0_i32_0 : i32, i32, i32
  }
  func.func @transform_1(%arg0: i32) -> (i32, i32, i32) {
    %c0_i32 = arith.constant 0 : i32
    %c0_i32_0 = arith.constant 0 : i32
    %c0_i32_1 = arith.constant 0 : i32
    return %arg0, %c0_i32, %c0_i32_0 : i32, i32, i32
  }
  func.func @transform_2(%arg0: i32) -> (i32, i32, i32) {
    %c0_i32 = arith.constant 0 : i32
    %c0_i32_0 = arith.constant 0 : i32
    %c0_i32_1 = arith.constant 0 : i32
    return %arg0, %c0_i32, %c0_i32_0 : i32, i32, i32
  }
}

</mosaic_0001>

<bundles_post_ra>
// kernel: tpu_custom_call.1
= control target key start
LH: loop header
LB: loop body
LE: loop exit
PB: predicated region body
PF: predicated region fallthrough
CT: control target
= control target key end

     0   :  { %7 = vsyncpa [#allocation3], 0  ;;  %s725_s0 = inlined_call_operand.hbm [shape: f32[8,2,32], index: 0, kind: input, shape index: {}]   ;;  %s726_s1 = inlined_call_operand.hbm [shape: f32[8,1,32], index: 1, kind: input, shape index: {}]   ;;  %s727_s2 = inlined_call_operand.hbm [shape: f32[8,2,32], index: 2, kind: output, shape index: {}]  }
   0x1   :  { %9 = vsyncpa [#allocation3 + $0x1], 0 }
   0x2   :  { %10 = vsyncpa [#allocation6], 0 }
   0x3   :  { %12 = vsyncpa [#allocation6 + $0x1], 0 }
   0x4   :  { %13 = vsyncpa [#allocation4], 0 }
   0x5   :  { %15 = vsyncpa [#allocation4 + $0x1], 0  ;;  %s523_s9 = smov 0   ;;  %s525_s10 = smov 0  }
   0x6   :  { %s527_s11 = smov 0   ;;  %s529_s12 = smov 0  }
   0x7 LB: > { %s544_s13 = sadd.s32 4294967295, %s503_s12   ;;  %s308_s14 = sadd.s32 4294967294, %s503_s12   ;;  %s503_s12 = sphi %s529_s12, %s745_s12   ;;  %s499_s11 = sphi %s527_s11, %s744_s11   ;;  %s495_s10 = sphi %s525_s10, %s743_s10   ;;  %s491_s9 = sphi %s523_s9, %s742_s9  }
   0x8   : > { %s548_s15 = sadd.s32 1, %s503_s12   ;;  %s28_s16 = sadd.s32 1, %s499_s11 }
   0x9   : > { %s25_s17 = ssub.s32 %s503_s12, %s548_s15  ;;  %p35_p0 = scmp.ne.s32.totalorder %s499_s11, %s495_s10 }
   0xa   : > { %p26_p1 = scmp.eq.s32.totalorder %s25_s17, 0  ;;  %p36_p2 = scmp.eq.s32.totalorder %s503_s12, 0 }
   0xb   : > { %p41_p3 = scmp.ne.s32.totalorder %s495_s10, %s491_s9  ;;  %p42_p4 = scmp.eq.s32.totalorder %s544_s13, 0 }
   0xc   : > { %s560_s18 = scalar_select %p26_p1, %s499_s11, %s28_s16  }
   0xd   : > { %p562_p5 = por %p36_p2, %p35_p0  ;;  %p566_p6 = por %p42_p4, %p41_p3 }
   0xe   : > { %p91_p7 = scmp.eq.s32.totalorder %s544_s13, 7  ;;  %p97_p8 = scmp.eq.s32.totalorder %s308_s14, 7 }
   0xf   : > { %s731_s20 = scalar_select %p566_p6, 1, 0 }
  0x10   : > { %p339_p9 = scmp.lt.s32.totalorder %s503_s12, 8  ;;  %p572_p10 = por %p91_p7, %p35_p0 }
  0x11   : > { %p576_p11 = por %p97_p8, %p41_p3  ;;  %s581_s23 = sand.u32 1, %s499_s11  }
  0x12   : > { %s732_s21 = scalar_select %p572_p10, 1, 0 }
  0x13   : > { %s733_s22 = scalar_select %p576_p11, 1, 0 }
  0x14   : > { %s312_s24 = sshll.u32 %s503_s12, 5  ;;  %s311_s25 = sshll.u32 %s581_s23, 1 }
  0x15   : > { %s588_s28 = scalar_lea.hbm %s725_s0, %s312_s24  ;;  %s121_s29 = scalar_lea.vmem [#allocation2], %s311_s25 }
  0x16   : > { %s128_s30 = sshll.u32 %s121_s29, 4  ;;  %p592_p12 = pnand %p339_p9, %p562_p5  ;;  %s596_s30 = int_to_ptr.vmem [resolvable:$true] %s128_s30 }
  0x17   : > { %s118_s4 = scalar_lea.sflag [#allocation3], %s581_s23  ;;  %s373_s5 = scalar_lea.hbm %s588_s28, 32 }
  0x18   : > { %p374_p1 = scmp.ne.s32.totalorder %s588_s28, %s373_s5  ;;  %p375_p2 = pneg %p592_p12 }
  0x19   : > { %s378_s8 = scalar_lea.hbm %s725_s0, 256  ;;  %p379_p5 = scmp.lt.u32.totalorder %s588_s28, %s725_s0 }
  0x1a   : > { %p376_p3 = pnand %p375_p2, %p374_p1  ;;  %p380_p7 = scmp.lt.u32.totalorder %s378_s8, %s373_s5 }
  0x1b   : > { %p382_p9 = scmp.lt.u32.totalorder %s373_s5, %s588_s28 }
  0x1c   : > { %p377_p4 = pneg %p376_p3  ;;  %p381_p8 = por %p380_p7, %p379_p5 }
  0x1e   : > { %p383_p13 = por %p382_p9, %p381_p8 }
  0x20   : > { %p384_p0 = pnand %p383_p13, %p377_p4 }
  0x22   : > { %387 = shalt.err (!%p384_p0)
}
  0x23   : > { %s388_s17 = scalar_lea.vmem %s596_s30, 32  ;;  %s505_s19 = smov [#allocation2]  }
  0x24   : > { %p389_p1 = scmp.ne.s32.totalorder %s596_s30, %s388_s17  ;;  %s393_s24 = sshll.u32 %s505_s19, 4  ;;  %s394_s24 = int_to_ptr.vmem [resolvable:$false] %s393_s24 }
  0x25   : > { %s395_s25 = scalar_lea.vmem %s394_s24, 64  ;;  %p396_p10 = scmp.lt.s32.totalorder %s596_s30, %s394_s24 }
  0x26   : > { %p391_p3 = pnand %p389_p1, %p375_p2  ;;  %p397_p5 = scmp.lt.s32.totalorder %s395_s25, %s388_s17 }
  0x28   : > { %p392_p11 = pneg %p391_p3  ;;  %p398_p7 = por %p397_p5, %p396_p10 }
  0x2a   : > { %p399_p8 = pnand %p398_p7, %p392_p11 }
  0x2c   : > { %402 = shalt.err (!%p399_p8)
}
  0x2d   : > { %331 = dma.hbm_to_vmem [thread:$0]  (!%p592_p12), %s588_s28, 32, %s596_s30, %s118_s4  }
  0x2e   : > { %p735_p13 = scmp.lt.s32.totalorder %s503_s12, 9  ;;  %p736_p0 = scmp.ge.s32.totalorder %s503_s12, 1 }
  0x2f   : > { %s313_s27 = sshll.u32 %s503_s12, 4  ;;  %s138_s7 = scalar_lea.vmem [#allocation5], %s581_s23 }
  0x30   : > { %p630_p4 = pnand %p736_p0, %p735_p13  ;;  %s638_s6 = scalar_lea.hbm %s726_s1, %s313_s27 }
  0x31   : > { %s145_s8 = sshll.u32 %s138_s7, 4  ;;  %s136_s28 = scalar_lea.sflag [#allocation6], %s581_s23  ;;  %s146_s8 = int_to_ptr.vmem [resolvable:$true] %s145_s8 }
  0x32   : > { %s737_s26 = scalar_select %p630_p4, 1, 0 }
  0x33   : > { %s403_s30 = scalar_lea.hbm %s638_s6, 16  ;;  %s408_s16 = scalar_lea.hbm %s726_s1, 128 }
  0x34   : > { %p404_p10 = scmp.ne.s32.totalorder %s638_s6, %s403_s30  ;;  %p409_p1 = scmp.lt.u32.totalorder %s638_s6, %s726_s1 }
  0x35   : > { %p410_p3 = scmp.lt.u32.totalorder %s408_s16, %s403_s30  ;;  %p412_p7 = scmp.lt.u32.totalorder %s403_s30, %s638_s6 }
  0x36   : > { %p406_p11 = pnand %p404_p10, %p375_p2 }
  0x37   : > { %p411_p5 = por %p410_p3, %p409_p1 }
  0x38   : > { %p407_p9 = pneg %p406_p11 }
  0x39   : > { %p413_p8 = por %p412_p7, %p411_p5 }
  0x3b   : > { %p414_p13 = pnand %p413_p8, %p407_p9 }
  0x3d   : > { %417 = shalt.err (!%p414_p13)
}
  0x3e   : > { %s418_s23 = scalar_lea.vmem %s146_s8, 16  ;;  %s506_s24 = smov [#allocation5]  }
  0x3f   : > { %p419_p0 = scmp.ne.s32.totalorder %s146_s8, %s418_s23  ;;  %s423_s25 = sshll.u32 %s506_s24, 4  ;;  %s424_s25 = int_to_ptr.vmem [resolvable:$false] %s423_s25 }
  0x40   : > { %s425_s27 = scalar_lea.vmem %s424_s25, 32  ;;  %p426_p6 = scmp.lt.s32.totalorder %s146_s8, %s424_s25 }
  0x41   : > { %p421_p10 = pnand %p419_p0, %p375_p2  ;;  %p427_p4 = scmp.lt.s32.totalorder %s425_s27, %s418_s23 }
  0x43   : > { %p422_p11 = pneg %p421_p10  ;;  %p428_p1 = por %p427_p4, %p426_p6 }
  0x45   : > { %p429_p3 = pnand %p428_p1, %p422_p11 }
  0x47   : > { %432 = shalt.err (!%p429_p3)
}
  0x48   : > { %334 = dma.hbm_to_vmem [thread:$0]  (!%p592_p12), %s638_s6, 16, %s146_s8, %s136_s28  }
  0x49   : > { %p738_p9 = scmp.ne.s32.totalorder %s737_s26, 0 }
  0x4a   : > { %s664_s29 = sand.u32 (!%p738_p9), 1, %s495_s10   ;;  %p739_p2 = scmp.ne.s32.totalorder (!%p738_p9), %s731_s20, 0 }
  0x4b   : > { %154 = sbr.rel (%p738_p9) target bundleno = 111 (0x6f), region = 28  ;;  %s315_s5 = sshll.u32 (!%p738_p9), %s664_s29, 1 }
  0x4c   : > { %s157_s7 = scalar_lea.sflag (!%p738_p9), [#allocation3], %s664_s29  ;;  %s160_s30 = scalar_lea.vmem (!%p738_p9), [#allocation2], %s315_s5 }
  0x52   : > { %478 = dma.done.wait (%p739_p2), %s157_s7, 32  }
  0x53   : > { %480 = vsyncadd (%p739_p2), %s157_s7, 4294967264  ;;  %s166_s3 = scalar_lea.sflag [#allocation6], %s664_s29  ;;  %s168_s26 = scalar_lea.vmem [#allocation5], %s664_s29 }
  0x54   : > { %482 = dma.done.wait (%p739_p2), %s166_s3, 16  }
  0x55   : > { %484 = vsyncadd (%p739_p2), %s166_s3, 4294967280  ;;  %s192_s6 = scalar_lea.vmem [#allocation7], %s315_s5  ;;  %s319_s28 = sshll.u32 %s544_s13, 5  ;;  %v193_v0 = vld [vmem:[%s160_s30] sm:$0x3]  ;;  %vm202_vm0 = vcmask 254976  }
  0x56   : > { %s218_s8 = sshll.u32 %s192_s6, 4  ;;  %v317_v1 = vld [vmem:[%s168_s26] ss:$0 sm:$0xff]  ;;  %s684_s20 = scalar_lea.hbm %s727_s2, %s319_s28  ;;  %s679_s8 = int_to_ptr.vmem [resolvable:$true] %s218_s8 }
  0x57   : > { %v201_v2 = vadd.f32 %v317_v1, %v193_v0  ;;  %s205_s16 = scalar_lea.sflag [#allocation4], %s664_s29  ;;  %s433_s17 = scalar_lea.vmem %s679_s8, 32 }
  0x58   : > { %p434_p6 = scmp.ne.s32.totalorder %s679_s8, %s433_s17  ;;  %p740_p12 = scmp.ne.s32.totalorder %s732_s21, 0 }
  0x59   : > { %203 = vst.msk [vmem:[%s192_s6] sm:$0x3] %vm202_vm0, %v201_v2  ;;  %s507_s13 = smov [#allocation7]  }
  0x5a   : > { %p435_p4 = pnand %p434_p6, %p740_p12  ;;  %s437_s19 = sshll.u32 %s507_s13, 4  ;;  %s438_s19 = int_to_ptr.vmem [resolvable:$false] %s437_s19 }
  0x5b   : > { %s439_s23 = scalar_lea.vmem %s438_s19, 64  ;;  %p440_p7 = scmp.lt.s32.totalorder %s679_s8, %s438_s19 }
  0x5c   : > { %p436_p5 = pneg %p435_p4  ;;  %p441_p8 = scmp.lt.s32.totalorder %s439_s23, %s433_s17 }
  0x5e   : > { %p442_p13 = por %p441_p8, %p440_p7 }
  0x60   : > { %p443_p0 = pnand %p442_p13, %p436_p5 }
  0x62   : > { %446 = shalt.err (!%p443_p0)
}
  0x63   : > { %s447_s24 = scalar_lea.hbm %s684_s20, 32  ;;  %s451_s29 = scalar_lea.hbm %s727_s2, 256 }
  0x64   : > { %p448_p10 = scmp.ne.s32.totalorder %s684_s20, %s447_s24  ;;  %p452_p3 = scmp.lt.u32.totalorder %s684_s20, %s727_s2 }
  0x65   : > { %p453_p9 = scmp.lt.u32.totalorder %s451_s29, %s447_s24  ;;  %p455_p6 = scmp.lt.u32.totalorder %s447_s24, %s684_s20 }
  0x66   : > { %p449_p11 = pnand %p448_p10, %p740_p12 }
  0x67   : > { %p454_p2 = por %p453_p9, %p452_p3 }
  0x68   : > { %p450_p1 = pneg %p449_p11 }
  0x69   : > { %p456_p4 = por %p455_p6, %p454_p2 }
  0x6b   : > { %p457_p5 = pnand %p456_p4, %p450_p1 }
  0x6d   : > { %460 = shalt.err (!%p457_p5)
}
  0x6e   : > { %326 = dma.vmem_to_hbm [thread:$0]  (%p740_p12), %s679_s8, 32, %s684_s20, %s205_s16  }
  0x6f PF: > { %p340_p7 = scmp.ge.s32.totalorder %s503_s12, 2  ;;  %s230_s30 = sand.u32 1, %s491_s9  }
  0x70   : > { %p741_p8 = scmp.ne.s32.totalorder %s733_s22, 0  ;;  %s231_s3 = scalar_lea.sflag [#allocation4], %s230_s30 }
  0x72   : > { %p336_p13 = pnand %p340_p7, %p741_p8 }
  0x74   : > { %486 = dma.done.wait (!%p336_p13), %s231_s3, 32  }
  0x75   : > { %488 = vsyncadd (!%p336_p13), %s231_s3, 4294967264  ;;  %p18_p0 = scmp.ge.s32.totalorder %s548_s15, 10   ;;  %s742_s9 = smov %s495_s10 }
  0x76   : > { %s743_s10 = smov %s499_s11  ;;  %s744_s11 = smov %s560_s18 }
  0x77   : > { %s745_s12 = smov %s548_s15  ;;  %20 = sbr.rel (!%p18_p0) target bundleno = 7 (0x7), region = 86 }
  0x7e   :  { %236 = vsyncpa [#allocation3], 1 }
  0x7f   :  { %238 = vsyncpa [#allocation3 + $0x1], 1 }
  0x80   :  { %239 = vsyncpa [#allocation6], 1 }
  0x81   :  { %241 = vsyncpa [#allocation6 + $0x1], 1 }
  0x82   :  { %242 = vsyncpa [#allocation4], 1 }
  0x83   :  { %244 = vsyncpa [#allocation4 + $0x1], 1 }

</bundles_post_ra>
